<compile_context>
chip_gen: v7x
topology: tpu7x:2x2x1
jax: 0.10.0
libtpu: 0.0.40
codegen_flags: <defaults>
</compile_context>

<pallas_src>
import jax
import jax.numpy as jnp
from jax.experimental import pallas as pl
from jax.experimental.pallas import tpu as pltpu


def _round_up(x, m):
    return ((x + m - 1) // m) * m


def _patch_embed_kernel(x_ref, w_ref, b_ref, o_ref):
    # x_ref: (tm, K)      patch tile (compute dtype)
    # w_ref: (K, E_pad)   flattened conv weight (constant index_map -> resident)
    # b_ref: (1, E_pad)   f32 bias (resident)
    # o_ref: (tm, E_pad)  output tile (lane-dense E_pad)
    acc = jnp.dot(x_ref[...], w_ref[...], preferred_element_type=jnp.float32)
    o_ref[...] = (acc + b_ref[...]).astype(o_ref.dtype)


def patch_embed_matmul(patches, w_flat_t, bias2d, *, out_dtype, tm):
    """patches: (M, K), w_flat_t: (K, E_pad), bias2d: (1, E_pad) f32.

    Returns (M, E_pad) in out_dtype.  M need NOT be a multiple of tm: the last
    grid step is a ragged tile (masked writeback), no padding copy is made.
    """
    M, K = patches.shape
    _, E_pad = w_flat_t.shape
    grid_m = pl.cdiv(M, tm)

    in_itemsize = jnp.dtype(patches.dtype).itemsize
    w_itemsize = jnp.dtype(w_flat_t.dtype).itemsize
    out_itemsize = jnp.dtype(out_dtype).itemsize
    cost = pl.CostEstimate(
        flops=2 * M * K * E_pad,
        transcendentals=0,
        bytes_accessed=(M * K * in_itemsize + K * E_pad * w_itemsize
                        + E_pad * 4 + M * E_pad * out_itemsize),
    )

    return pl.pallas_call(
        _patch_embed_kernel,
        out_shape=jax.ShapeDtypeStruct((M, E_pad), out_dtype),
        grid_spec=pltpu.PrefetchScalarGridSpec(
            num_scalar_prefetch=0,
            grid=(grid_m,),
            in_specs=[
                # Streamed patch tiles over the (parallel) M axis.
                pl.BlockSpec((tm, K), lambda i: (i, 0)),
                # Weight & bias: constant index_map -> fetched once, VMEM-resident.
                # TODO(synk): pipeline_mode=pl.Buffered(1) would reclaim ~K*E_pad
                # bytes of VMEM on v7x; left at default buffering to stay robust.
                pl.BlockSpec((K, E_pad), lambda i: (0, 0)),
                pl.BlockSpec((1, E_pad), lambda i: (0, 0)),
            ],
            out_specs=pl.BlockSpec((tm, E_pad), lambda i: (i, 0)),
        ),
        compiler_params=pltpu.CompilerParams(
            dimension_semantics=("parallel",)),
        cost_estimate=cost,
    )(patches, w_flat_t, bias2d)


def patch_embed_forward(x, weight, bias, patch_size, *,
                        compute_dtype=jnp.bfloat16, out_dtype=None, tm=1024):
    """x: (B, C, H, W) or (B, C, T, H, W); weight: (E, C, p, p); bias: (E,).

    4-D input returns (B, num_patches, E)    == proj(x).flatten(2).transpose(1, 2)
    5-D input returns (B, T*num_patches, E)  == rearrange('(b t) c h w -> b (t h w) c')
    """
    if out_dtype is None:
        out_dtype = compute_dtype

    if x.ndim == 5:
        B0, C0, T0, H0, W0 = x.shape
        x4 = jnp.transpose(x, (0, 2, 1, 3, 4)).reshape(B0 * T0, C0, H0, W0)
        out = patch_embed_forward(x4, weight, bias, patch_size,
                                  compute_dtype=compute_dtype,
                                  out_dtype=out_dtype, tm=tm)
        return out.reshape(B0, -1, weight.shape[0])

    B, C, H, W = x.shape
    p = patch_size
    assert H % p == 0 and W % p == 0, "H and W must be divisible by patch_size"
    Hp, Wp = H // p, W // p
    E = weight.shape[0]
    K = C * p * p
    M = B * Hp * Wp

    # --- patch extraction (wrapper glue); cast first so the reorder moves the
    #     narrow dtype.  See TODO(synk) at the top about fusing this.
    xc = x if x.dtype == compute_dtype else x.astype(compute_dtype)
    xp = xc.reshape(B, C, Hp, p, Wp, p)
    xp = jnp.transpose(xp, (0, 2, 4, 1, 3, 5))          # (B, Hp, Wp, C, p, p)
    patches = xp.reshape(M, K)                          # (M, K), (c, ph, pw) order

    # --- weight / bias prep (tiny tensors; reorder/pad is essentially free).
    w_flat_t = weight.reshape(E, K).T.astype(compute_dtype)   # (K, E), (c, ph, pw) rows
    b2 = bias.reshape(1, E).astype(jnp.float32)

    # Pad E to a multiple of 128 for lane-dense (unmasked) output stores.
    E_pad = _round_up(E, 128)
    if E_pad != E:
        w_flat_t = jnp.pad(w_flat_t, ((0, 0), (0, E_pad - E)))
        b2 = jnp.pad(b2, ((0, 0), (0, E_pad - E)))

    # --- M tile selection (no padding of the patch tensor).
    if M <= tm:
        # Aim for >= 2 grid steps so the "parallel" axis can shard across the
        # two TensorCores on v7x; 16-row alignment for bf16 sublane packing.
        half = -(-M // 2)
        tm_eff = min(_round_up(half, 16), _round_up(M, 8))
        tm_eff = max(tm_eff, 8)
    else:
        tm_eff = tm

    # Keep the (double-buffered) per-step working set inside the default scoped
    # VMEM limit of the smallest generation (v5e: 16 MiB) with headroom.
    in_itemsize = jnp.dtype(compute_dtype).itemsize
    out_itemsize = jnp.dtype(out_dtype).itemsize

    def _vmem_bytes(t):
        return (2 * t * K * in_itemsize            # patch tiles (double-buffered)
                + 2 * t * E_pad * out_itemsize     # output tiles
                + 2 * K * E_pad * in_itemsize      # resident weight buffers
                + 2 * E_pad * 4)                   # bias
    while tm_eff > 16 and _vmem_bytes(tm_eff) > 12 * 1024 * 1024:
        tm_eff = max(16, tm_eff // 2)

    out = patch_embed_matmul(patches, w_flat_t, b2,
                             out_dtype=out_dtype, tm=tm_eff)   # (M, E_pad)
    if E_pad != E:
        out = out[:, :E]
    return out.reshape(B, Hp * Wp, E)                          # (B, num_patches, E)


def _reference(x, weight, bias, patch_size):
    E = weight.shape[0]
    ref = jax.lax.conv_general_dilated(
        x, weight, window_strides=(patch_size, patch_size), padding="VALID",
        dimension_numbers=("NCHW", "OIHW", "NCHW"))
    ref = ref + bias.reshape(1, E, 1, 1)
    B = x.shape[0]
    return ref.reshape(B, E, -1).transpose(0, 2, 1)


def _reference5(x5, weight, bias, patch_size):
    B, C, T, H, W = x5.shape
    x4 = jnp.transpose(x5, (0, 2, 1, 3, 4)).reshape(B * T, C, H, W)
    r = _reference(x4, weight, bias, patch_size)
    return r.reshape(B, -1, r.shape[-1])


if __name__ == "__main__":
    key = jax.random.PRNGKey(0)
    kx, kw, kb, kx2, kx3 = jax.random.split(key, 5)

    # Small shapes consistent with the module: patch=8, C=3, E=32.
    B, C, H, W = 2, 3, 16, 16
    patch_size = 8
    embed_dim = 32

    x = jax.random.normal(kx, (B, C, H, W), dtype=jnp.float32)
    weight = jax.random.normal(kw, (embed_dim, C, patch_size, patch_size),
                               dtype=jnp.float32) * 0.02
    bias = jax.random.normal(kb, (embed_dim,), dtype=jnp.float32) * 0.02

    # 1) Tiny input (single ragged-free tile).
    out = patch_embed_forward(x, weight, bias, patch_size)
    out = jax.block_until_ready(out)
    ref = _reference(x, weight, bias, patch_size)
    assert out.shape == (B, (H // patch_size) * (W // patch_size), embed_dim)
    # bf16 compute/output with f32 accumulation -> loosened tolerance.
    assert jnp.allclose(out.astype(jnp.float32), ref, atol=2e-2, rtol=2e-2), (
        float(jnp.max(jnp.abs(out.astype(jnp.float32) - ref))))

    # 2) Multi-tile + ragged last tile (M = 2*5*5 = 50, auto tile = 32 -> grid 2).
    H2 = W2 = 40
    x2 = jax.random.normal(kx2, (B, C, H2, W2), dtype=jnp.float32)
    out2 = patch_embed_forward(x2, weight, bias, patch_size)
    out2 = jax.block_until_ready(out2)
    ref2 = _reference(x2, weight, bias, patch_size)
    assert out2.shape == (B, (H2 // patch_size) * (W2 // patch_size), embed_dim)
    assert jnp.allclose(out2.astype(jnp.float32), ref2, atol=2e-2, rtol=2e-2), (
        float(jnp.max(jnp.abs(out2.astype(jnp.float32) - ref2))))

    # 3) 5-D video input path, explicit small tile (M = 36 > tm=16 -> grid 3, ragged).
    T3, H3, W3 = 2, 24, 24
    x3 = jax.random.normal(kx3, (B, C, T3, H3, W3), dtype=jnp.float32)
    out3 = patch_embed_forward(x3, weight, bias, patch_size, tm=16)
    out3 = jax.block_until_ready(out3)
    ref3 = _reference5(x3, weight, bias, patch_size)
    assert out3.shape == (B, T3 * (H3 // patch_size) * (W3 // patch_size), embed_dim)
    assert jnp.allclose(out3.astype(jnp.float32), ref3, atol=2e-2, rtol=2e-2), (
        float(jnp.max(jnp.abs(out3.astype(jnp.float32) - ref3))))

    print("KERNEL_OK")
</pallas_src>

<mosaic_0001>
module attributes {stable_mosaic.version = 11 : i64} {
  func.func @_patch_embed_kernel(%arg0: i32, %arg1: memref<8x192xbf16, #tpu.memory_space<vmem>>, %arg2: memref<192x128xbf16, #tpu.memory_space<vmem>>, %arg3: memref<1x128xf32, #tpu.memory_space<vmem>>, %arg4: memref<8x128xbf16, #tpu.memory_space<vmem>>) attributes {dimension_semantics = [#tpu.dimension_semantics<parallel>], iteration_bounds = array<i64: 1>, scalar_prefetch = 0 : i64, scratch_operands = 0 : i64, tpu.core_type = #tpu.core_type<tc>, window_params = [{transform_indices = @transform_0, window_bounds = array<i64: 8, 192>}, {pipeline_mode = #tpu.pipeline_mode<synchronous>, transform_indices = @transform_1, window_bounds = array<i64: 192, 128>}, {pipeline_mode = #tpu.pipeline_mode<synchronous>, transform_indices = @transform_2, window_bounds = array<i64: 1, 128>}, {transform_indices = @transform_3, window_bounds = array<i64: 8, 128>}]} {
    %c0 = arith.constant 0 : index
    %c0_0 = arith.constant 0 : index
    %0 = vector.load %arg1[%c0, %c0_0] : memref<8x192xbf16, #tpu.memory_space<vmem>>, vector<8x192xbf16>
    %c0_1 = arith.constant 0 : index
    %c0_2 = arith.constant 0 : index
    %1 = vector.load %arg2[%c0_1, %c0_2] : memref<192x128xbf16, #tpu.memory_space<vmem>>, vector<192x128xbf16>
    %cst = arith.constant dense<0.000000e+00> : vector<8x128xf32>
    %2 = tpu.matmul %0, %1, %cst {dimension_numbers = #tpu.dot_dimension_numbers<[1], [0], [0], [1], [0, 0, 1, 1], [], []>} : vector<8x192xbf16>, vector<192x128xbf16>, vector<8x128xf32> -> vector<8x128xf32>
    %c0_3 = arith.constant 0 : index
    %c0_4 = arith.constant 0 : index
    %3 = vector.load %arg3[%c0_3, %c0_4] : memref<1x128xf32, #tpu.memory_space<vmem>>, vector<1x128xf32>
    %4 = vector.broadcast %3 : vector<1x128xf32> to vector<8x128xf32>
    %5 = arith.addf %2, %4 : vector<8x128xf32>
    %6 = arith.truncf %5 : vector<8x128xf32> to vector<8x128xbf16>
    %c0_5 = arith.constant 0 : index
    %c0_6 = arith.constant 0 : index
    %7 = vector.load %arg4[%c0_5, %c0_6] : memref<8x128xbf16, #tpu.memory_space<vmem>>, vector<8x128xbf16>
    tpu.vector_store %arg4[%c0_5, %c0_6], %6 {strides = array<i32>} : memref<8x128xbf16, #tpu.memory_space<vmem>>, vector<8x128xbf16>,
    return
  }
  func.func @transform_0(%arg0: i32) -> (i32, i32) {
    %c0_i32 = arith.constant 0 : i32
    %c0_i32_0 = arith.constant 0 : i32
    return %arg0, %c0_i32 : i32, i32
  }
  func.func @transform_1(%arg0: i32) -> (i32, i32) {
    %c0_i32 = arith.constant 0 : i32
    %c0_i32_0 = arith.constant 0 : i32
    %c0_i32_1 = arith.constant 0 : i32
    return %c0_i32, %c0_i32_0 : i32, i32
  }
  func.func @transform_2(%arg0: i32) -> (i32, i32) {
    %c0_i32 = arith.constant 0 : i32
    %c0_i32_0 = arith.constant 0 : i32
    %c0_i32_1 = arith.constant 0 : i32
    return %c0_i32, %c0_i32_0 : i32, i32
  }
  func.func @transform_3(%arg0: i32) -> (i32, i32) {
    %c0_i32 = arith.constant 0 : i32
    %c0_i32_0 = arith.constant 0 : i32
    return %arg0, %c0_i32 : i32, i32
  }
}

</mosaic_0001>

<bundles_post_ra>
// kernel: tpu_custom_call.1
= control target key start
LH: loop header
LB: loop body
LE: loop exit
PB: predicated region body
PF: predicated region fallthrough
CT: control target
= control target key end

     0   :  { %8 = vsyncpa [#allocation3], 0  ;;  %s394_s0 = inlined_call_operand.hbm [shape: bf16[8,192], index: 0, kind: input, shape index: {}]   ;;  %s395_s1 = inlined_call_operand.hbm [shape: bf16[192,128], index: 1, kind: input, shape index: {}]   ;;  %s396_s2 = inlined_call_operand.vmem [shape: f32[1,128], index: 2, kind: input, shape index: {}]   ;;  %s397_s3 = inlined_call_operand.hbm [shape: bf16[8,128], index: 3, kind: output, shape index: {}]  }
   0x1   :  { %9 = vsyncpa [#allocation6], 0 }
   0x2   :  { %10 = vsyncpa [#allocation4], 0  ;;  %s322_s12 = smov [#allocation2]   ;;  %s323_s14 = smov [#allocation5]  }
   0x3   :  { %s17_s13 = sshll.u32 %s322_s12, 4  ;;  %s26_s15 = sshll.u32 %s323_s14, 4  ;;  %s18_s13 = int_to_ptr.vmem [resolvable:$true] %s17_s13  ;;  %s348_s15 = int_to_ptr.vmem [resolvable:$true] %s26_s15 }
   0x4   :  { %s250_s18 = scalar_lea.hbm %s394_s0, 128 }
   0x5   :  { %p251_p0 = scmp.ne.s32.totalorder %s394_s0, %s250_s18  ;;  %p254_p1 = scmp.lt.u32.totalorder %s250_s18, %s394_s0 }
   0x7   :  { %p256_p2 = pnand %p254_p1, %p251_p0 }
   0x9   :  { %259 = shalt.err (!%p256_p2)
}
   0xa   :  { %s260_s23 = scalar_lea.vmem %s18_s13, 128  ;;  %p265_p4 = scmp.lt.s32.totalorder %s18_s13, %s18_s13 }
   0xb   :  { %p261_p3 = scmp.ne.s32.totalorder %s18_s13, %s260_s23  ;;  %p266_p5 = scmp.lt.s32.totalorder %s260_s23, %s260_s23 }
   0xd   :  { %p267_p6 = por %p266_p5, %p265_p4 }
   0xf   :  { %p268_p7 = pnand %p267_p6, %p261_p3 }
  0x11   :  { %271 = shalt.err (!%p268_p7)
}
  0x12   :  { %20 = dma.hbm_to_vmem [thread:$0]  %s394_s0, 128, %s18_s13, [#allocation3]  }
  0x13   :  { %s272_s28 = scalar_lea.hbm %s395_s1, 1536 }
  0x14   :  { %p273_p8 = scmp.ne.s32.totalorder %s395_s1, %s272_s28  ;;  %p276_p9 = scmp.lt.u32.totalorder %s272_s28, %s395_s1 }
  0x16   :  { %p278_p10 = pnand %p276_p9, %p273_p8 }
  0x18   :  { %281 = shalt.err (!%p278_p10)
}
  0x19   :  { %s282_s6 = scalar_lea.vmem %s348_s15, 1536  ;;  %p287_p12 = scmp.lt.s32.totalorder %s348_s15, %s348_s15 }
  0x1a   :  { %p283_p11 = scmp.ne.s32.totalorder %s348_s15, %s282_s6  ;;  %p288_p13 = scmp.lt.s32.totalorder %s282_s6, %s282_s6 }
  0x1c   :  { %p289_p0 = por %p288_p13, %p287_p12 }
  0x1e   :  { %p290_p1 = pnand %p289_p0, %p283_p11 }
  0x20   :  { %293 = shalt.err (!%p290_p1)
}
  0x21   :  { %s324_s0 = smov 64   ;;  %s325_s7 = smov 4  }
  0x22   :  { %32 = dma.hbm_to_vmem [thread:$0]  %s395_s1, 1536, %s348_s15, [#allocation6], %s324_s0, %s324_s0, %s325_s7  }
  0x23   :  { %316 = dma.done.wait [#allocation3], 128  }
  0x24   :  { %317 = vsyncadd [#allocation3], 4294967168 }
  0x25   :  { %318 = dma.done.wait [#allocation6], 1536  }
  0x26   :  { %319 = vsyncadd [#allocation6], 4294965760  ;;  %v326_v0 = vmov 0   ;;  %v236_v1 = vld [vmem:[#allocation5] sm:$0xff]   ;;  %v237_v2 = vld [vmem:[#allocation5 + $0x8] sm:$0xff]   ;;  %vm152_vm0 = vcmask 523264  }
  0x27   :  { %156 = vmatprep.subr.bf16.mxu0 %v326_v0  ;;  %v238_v3 = vld [vmem:[#allocation5 + $0x10] sm:$0xff]   ;;  %v239_v4 = vld [vmem:[#allocation5 + $0x18] sm:$0xff]   ;;  %v240_v7 = vld [vmem:[#allocation5 + $0x20] sm:$0xff]   ;;  %s327_s11 = smov [#allocation7]  }
  0x28   :  { %157 = vmatpush1.bf16.msra.mxu0 %v236_v1  ;;  %v42_v5 = vld [vmem:[#allocation2] sm:$0xff]  ;;  %v241_v8 = vld [vmem:[#allocation5 + $0x28] sm:$0xff]   ;;  %v242_v9 = vld [vmem:[#allocation5 + $0x30] sm:$0xff]   ;;  %s204_s12 = sshll.u32 %s327_s11, 4  ;;  %s205_s12 = int_to_ptr.vmem [resolvable:$true] %s204_s12 }
  0x29   :  { %158 = vmatprep.subr.bf16.mxu0 %v326_v0  ;;  %v216_v6 = vcombine.high %v42_v5, %v42_v5  ;;  %v243_v10 = vld [vmem:[#allocation5 + $0x38] sm:$0xff]   ;;  %v244_v11 = vld [vmem:[#allocation5 + $0x40] sm:$0xff]   ;;  %v245_v12 = vld [vmem:[#allocation5 + $0x48] sm:$0xff]   ;;  %v215_v15 = vcombine.low %v42_v5, %v42_v5  ;;  %s294_s13 = scalar_lea.vmem %s205_s12, 64  ;;  %p299_p3 = scmp.lt.s32.totalorder %s205_s12, %s205_s12 }
  0x2a   :  { %v246_v13 = vld [vmem:[#allocation5 + $0x50] sm:$0xff]   ;;  %v247_v14 = vld [vmem:[#allocation5 + $0x58] sm:$0xff]   ;;  %p295_p2 = scmp.ne.s32.totalorder %s205_s12, %s294_s13  ;;  %p300_p4 = scmp.lt.s32.totalorder %s294_s13, %s294_s13 }
  0x2b   :  { %229 = vmatprep.mubr.msk.bf16.mxu0 %vm152_vm0, %v216_v6  ;;  %v214_v16 = vld [vmem:[%s396_s2] ss:$0 sm:$0xff] }
  0x2c   :  { %159 = vmatpush1.bf16.msra.mxu0 %v237_v2  ;;  %p301_p5 = por %p300_p4, %p299_p3 }
  0x2d   :  { %160 = vmatprep.subr.bf16.mxu0 %v326_v0 }
  0x2e   :  { %p302_p6 = pnand %p301_p5, %p295_p2 }
  0x30   :  { %161 = vmatpush1.bf16.msra.mxu0 %v238_v3 }
  0x31   :  { %162 = vmatprep.subr.bf16.mxu0 %v326_v0 }
  0x34   :  { %163 = vmatpush1.bf16.msra.mxu0 %v239_v4 }
  0x35   :  { %164 = vmatprep.subr.bf16.mxu0 %v326_v0 }
  0x38   :  { %165 = vmatpush1.bf16.msra.mxu0 %v240_v7 }
  0x39   :  { %166 = vmatprep.subr.bf16.mxu0 %v326_v0 }
  0x3c   :  { %167 = vmatpush1.bf16.msra.mxu0 %v241_v8 }
  0x3d   :  { %168 = vmatprep.subr.bf16.mxu0 %v326_v0 }
  0x40   :  { %169 = vmatpush1.bf16.msra.mxu0 %v242_v9 }
  0x41   :  { %170 = vmatprep.subr.bf16.mxu0 %v326_v0 }
  0x44   :  { %171 = vmatpush1.bf16.msra.mxu0 %v243_v10 }
  0x45   :  { %172 = vmatprep.subr.bf16.mxu0 %v326_v0 }
  0x48   :  { %173 = vmatpush1.bf16.msra.mxu0 %v244_v11 }
  0x49   :  { %174 = vmatprep.subr.bf16.mxu0 %v326_v0 }
  0x4c   :  { %175 = vmatpush1.bf16.msra.mxu0 %v245_v12 }
  0x4d   :  { %176 = vmatprep.subr.bf16.mxu0 %v326_v0 }
  0x50   :  { %177 = vmatpush1.bf16.msra.mxu0 %v246_v13 }
  0x51   :  { %178 = vmatprep.subr.bf16.mxu0 %v326_v0 }
  0x54   :  { %179 = vmatpush1.bf16.msra.mxu0 %v247_v14 }
  0x57   :  { %189 = vmatmul.mubr.bf16.vlgmr.msra.gmra.mrb[0].mxu0 %v215_v15 }
 0x12a   :  { %v190_v17 = vpop.f32.mrb[0].mxu0 }
 0x12b   :  { %v191_v18 = vadd.f32 %v214_v16, %v190_v17  ;;  %v192_v19 = vpop.f32.mrb[1].mxu0 }
 0x12c   :  { %v193_v20 = vpop.f32.mrb[2].mxu0 }
 0x12d   :  { %v196_v21 = vpack.c.bf16 %v191_v18, %v191_v18  ;;  %v194_v22 = vpop.f32.mrb[3].mxu0 }
 0x12f   :  { %197 = vst [vmem:[#allocation7] sm:$0xf] %v196_v21 }
 0x130   :  { %305 = shalt.err (!%p302_p6)
}
 0x131   :  { %s306_s2 = scalar_lea.hbm %s397_s3, 64 }
 0x132   :  { %p307_p7 = scmp.ne.s32.totalorder %s397_s3, %s306_s2  ;;  %p310_p8 = scmp.lt.u32.totalorder %s306_s2, %s397_s3 }
 0x134   :  { %p312_p9 = pnand %p310_p8, %p307_p7 }
 0x136   :  { %315 = shalt.err (!%p312_p9)
}
 0x137   :  { %207 = dma.vmem_to_hbm [thread:$0]  %s205_s12, 64, %s397_s3, [#allocation4]  }
 0x138   :  { %320 = dma.done.wait [#allocation4], 64  }
 0x139   :  { %321 = vsyncadd [#allocation4], 4294967232 }
 0x13a   :  { %211 = vsyncpa [#allocation3], 1 }
 0x13b   :  { %212 = vsyncpa [#allocation6], 1 }
 0x13c   :  { %213 = vsyncpa [#allocation4], 1 }

</bundles_post_ra>
